<compile_context>
chip_gen: v5e
topology: v5e:2x2
jax: 0.10.0
libtpu: 0.0.40
codegen_flags: <defaults>
</compile_context>

<pallas_src>
import jax
import jax.numpy as jnp
import numpy as np
from jax import lax
from jax.experimental import pallas as pl
from jax.experimental.pallas import tpu as pltpu

DOT_DTYPE = jnp.bfloat16   # MXU operand dtype (set to jnp.float32 to disable mixed precision)
B_TILE = 2                 # samples packed on the lane axis per grid step (must be even)


# --------------------------------------------------------------------------- roll convention

def _probe_roll_sign():
    """Determine pltpu.roll's rotation direction once (robust across jax versions).

    Returns sgn such that pltpu.roll(x, (sgn*off) % n, axis=-1)[..., i] == x[..., (i+off) % n].
    """
    n = 256

    def kernel(x_ref, o_ref):
        o_ref[...] = pltpu.roll(x_ref[...], 1, axis=1)

    x = lax.broadcasted_iota(jnp.float32, (8, n), 1)
    y = pl.pallas_call(kernel, out_shape=jax.ShapeDtypeStruct((8, n), jnp.float32))(x)
    first = int(jax.device_get(y)[0, 0])
    return -1 if first == n - 1 else 1


def _shift_lanes(x, off, sgn):
    """y[..., l] = x[..., (l + off) % n] (lane rotate on the XLU)."""
    n = x.shape[-1]
    amt = (sgn * off) % n
    if amt == 0:
        return x
    return pltpu.roll(x, amt, axis=1)


# --------------------------------------------------------------------------- in-kernel stages
# Activations are (C, B_TILE * frame_h * frame_w) f32: every sample's dense spatial frame is
# flattened row-major and the B_TILE frames are laid side by side on the lane axis.

def _conv3x3_relu(a, w_ref, b_ref, mask, fw, sgn):
    """3x3 'same' conv + bias + ReLU.  All 9 taps stacked along K -> a single MXU dot."""
    taps = []
    k = 0
    for dh in (-1, 0, 1):
        for dw in (-1, 0, 1):
            off = dh * fw + dw
            if off == 0:                          # center tap: mask is all-ones
                taps.append(a)
            else:
                taps.append(_shift_lanes(a, off, sgn) * mask[k:k + 1, :])
            k += 1
    stacked = jnp.concatenate(taps, axis=0).astype(DOT_DTYPE)      # (9*Cin, L)
    out = jnp.dot(w_ref[...], stacked, preferred_element_type=jnp.float32)
    return jnp.maximum(out + b_ref[...], 0.0)


def _make_kernel(n_blocks, frames, q_positions, roll_sgn):
    def kernel(*refs):
        x_ref, o_ref = refs[0], refs[-1]
        prm = refs[1:-1]

        a = x_ref[0]                                               # (C0, B*H*W) f32
        i = 0
        for b in range(n_blocks):
            fh, fw = frames[b]
            mask = prm[i][...]                                     # (9, L_b) f32
            wa, ba, wb, bb = prm[i + 1], prm[i + 2], prm[i + 3], prm[i + 4]
            i += 5
            a = _conv3x3_relu(a, wa, ba, mask, fw, roll_sgn)
            a = _conv3x3_relu(a, wb, bb, mask, fw, roll_sgn)
            # 2x2 / stride-2 max pool: result lives at even-row/even-col anchors.
            a = jnp.maximum(a, _shift_lanes(a, 1, roll_sgn))
            a = jnp.maximum(a, _shift_lanes(a, fw, roll_sgn))
            if b < n_blocks - 1:
                # Gather anchors into the next block's dense frame (one-hot MXU matmul).
                a = jnp.dot(a.astype(DOT_DTYPE), prm[i][...],
                            preferred_element_type=jnp.float32)
                i += 1

        csel, w1p, b1c, w2, b2c = prm[i], prm[i + 1], prm[i + 2], prm[i + 3], prm[i + 4]
        # FC head: move the Q pooled anchors of every sample into rows via lane rolls, pick
        # each sample's frame-origin lane with one one-hot dot, then FC1 / FC2 as one dot each.
        # The torch NCHW flatten permutation is folded into w1p on the host.
        pieces = [_shift_lanes(a, p, roll_sgn) for p in q_positions]
        stacked = jnp.concatenate(pieces, axis=0).astype(DOT_DTYPE)    # (Q*C_last, B*FP)
        g = jnp.dot(stacked, csel[...], preferred_element_type=jnp.float32)      # (Q*C, B)
        h = jnp.dot(w1p[...], g.astype(DOT_DTYPE),
                    preferred_element_type=jnp.float32) + b1c[...]               # (hidden, B)
        h = jnp.maximum(h, 0.0)
        out = jnp.dot(w2[...], h.astype(DOT_DTYPE),
                      preferred_element_type=jnp.float32) + b2c[...]             # (n_out, B)
        o_ref[0] = out.astype(o_ref.dtype)

    return kernel


# --------------------------------------------------------------------------- wrapper

def _replicated_spec(shape):
    zeros = (0,) * len(shape)
    return pl.BlockSpec(shape, lambda i, zeros=zeros: zeros)


def build_simple_cnn_forward(layers_dim, input_hw, roll_sgn, b_tile=B_TILE):
    height, width = input_hw
    n_blocks = len(layers_dim) - 3
    c0, n_out = layers_dim[0], layers_dim[-1]
    assert b_tile % 2 == 0
    assert height % (1 << n_blocks) == 0 and width % (1 << n_blocks) == 0
    frames = [(height >> b, width >> b) for b in range(n_blocks)]
    fh_l, fw_l = frames[-1]
    out_h, out_w = fh_l // 2, fw_l // 2
    # embedded (post-pool) lane offset of every dense output position, in torch raster order
    q_positions = [(2 * (q // out_w)) * fw_l + 2 * (q % out_w) for q in range(out_h * out_w)]
    f0 = height * width
    kernel = _make_kernel(n_blocks, frames, q_positions, roll_sgn)

    def forward(x_nchw, packed):
        n = x_nchw.shape[0]
        n_tiles = -(-n // b_tile)
        n_pad = n_tiles * b_tile
        x = x_nchw.reshape(n, c0, f0)
        if n_pad != n:
            x = jnp.pad(x, ((0, n_pad - n), (0, 0), (0, 0)))
        # (tiles, B, C, F) -> (tiles, C, B*F): batch goes onto the lane axis (layout only).
        xk = x.reshape(n_tiles, b_tile, c0, f0).transpose(0, 2, 1, 3).reshape(
            n_tiles, c0, b_tile * f0)

        in_specs = [pl.BlockSpec((1, c0, b_tile * f0), lambda i: (i, 0, 0))]
        in_specs += [_replicated_spec(p.shape) for p in packed]
        out = pl.pallas_call(
            kernel,
            out_shape=jax.ShapeDtypeStruct((n_tiles, n_out, b_tile), jnp.float32),
            grid=(n_tiles,),
            in_specs=in_specs,
            out_specs=pl.BlockSpec((1, n_out, b_tile), lambda i: (i, 0, 0)),
            compiler_params=pltpu.CompilerParams(
                dimension_semantics=("parallel",),
                vmem_limit_bytes=32 * 1024 * 1024,
            ),
        )(xk, *packed)
        return out.transpose(0, 2, 1).reshape(n_pad, n_out)[:n]

    return jax.jit(forward)


# --------------------------------------------------------------------------- host-side packing

def _pack_conv_w(w_oihw):
    co, ci = w_oihw.shape[0], w_oihw.shape[1]
    return np.transpose(w_oihw, (0, 2, 3, 1)).reshape(co, 9 * ci)      # col = (kh*3+kw)*Cin + ci


def _tap_masks(fh, fw, b_tile):
    f = np.arange(fh * fw)
    r, c = f // fw, f % fw
    rows = []
    for dh in (-1, 0, 1):
        for dw in (-1, 0, 1):
            valid = (r + dh >= 0) & (r + dh < fh) & (c + dw >= 0) & (c + dw < fw)
            rows.append(valid.astype(np.float32))
    return np.tile(np.stack(rows), (1, b_tile))                        # (9, b_tile*fh*fw)


def _pool_compact(fh, fw, b_tile):
    """One-hot (b*fh*fw, b*(fh//2)*(fw//2)) gathering 2x2-pool anchors into the next frame."""
    f_src, f_dst = fh * fw, (fh // 2) * (fw // 2)
    s_mat = np.zeros((b_tile * f_src, b_tile * f_dst), np.float32)
    for s in range(b_tile):
        for g in range(f_dst):
            r2, c2 = g // (fw // 2), g % (fw // 2)
            s_mat[s * f_src + (2 * r2) * fw + 2 * c2, s * f_dst + g] = 1.0
    return s_mat


def pack_params(torch_params, layers_dim, input_hw, b_tile=B_TILE):
    """Repack torch-layout params (OIHW convs, (out,in) linears) for the fused kernel."""
    blocks, (fw1, fb1, fw2, fb2) = torch_params
    height, width = input_hw
    nb = len(blocks)
    c_last, hidden = layers_dim[-3], layers_dim[-2]
    packed = []
    for b, (w1, b1, w2, b2) in enumerate(blocks):
        fh, fw = height >> b, width >> b
        packed.append(jnp.asarray(_tap_masks(fh, fw, b_tile), dtype=jnp.float32))
        packed.append(jnp.asarray(_pack_conv_w(np.asarray(w1)), dtype=DOT_DTYPE))
        packed.append(jnp.asarray(np.asarray(b1)[:, None], dtype=jnp.float32))
        packed.append(jnp.asarray(_pack_conv_w(np.asarray(w2)), dtype=DOT_DTYPE))
        packed.append(jnp.asarray(np.asarray(b2)[:, None], dtype=jnp.float32))
        if b < nb - 1:
            packed.append(jnp.asarray(_pool_compact(fh, fw, b_tile), dtype=DOT_DTYPE))
    fh_l, fw_l = height >> (nb - 1), width >> (nb - 1)
    fp = fh_l * fw_l
    q = (fh_l // 2) * (fw_l // 2)
    # lane-select one-hot: picks the frame-origin lane of every sample
    csel = np.zeros((b_tile * fp, b_tile), np.float32)
    for s in range(b_tile):
        csel[s * fp, s] = 1.0
    packed.append(jnp.asarray(csel, dtype=DOT_DTYPE))
    # FC1 with the torch flatten permutation folded in: column (q*C + c)  <-  torch (c*Q + q)
    w1p = np.transpose(np.asarray(fw1).reshape(hidden, c_last, q), (0, 2, 1)).reshape(
        hidden, q * c_last)
    packed.append(jnp.asarray(w1p, dtype=DOT_DTYPE))
    packed.append(jnp.asarray(np.asarray(fb1)[:, None], dtype=jnp.float32))
    packed.append(jnp.asarray(np.asarray(fw2), dtype=DOT_DTYPE))
    packed.append(jnp.asarray(np.asarray(fb2)[:, None], dtype=jnp.float32))
    return tuple(packed)


# --------------------------------------------------------------------------- params & reference

def init_torch_params(key, layers_dim, input_hw):
    """Deterministic synthetic parameters in PyTorch layouts (OIHW convs, (out,in) linears)."""
    height, width = input_hw
    n_blocks = len(layers_dim) - 3
    flatten_dim = layers_dim[-3] * (height >> n_blocks) * (width >> n_blocks)
    hidden, n_out = layers_dim[-2], layers_dim[-1]
    keys = iter(jax.random.split(key, 4 * n_blocks + 4))
    blocks = []
    for c_in, c_out in zip(layers_dim[:-3], layers_dim[1:-2]):
        w1 = 0.1 * jax.random.normal(next(keys), (c_out, c_in, 3, 3), jnp.float32)
        b1 = 0.1 * jax.random.normal(next(keys), (c_out,), jnp.float32)
        w2 = 0.1 * jax.random.normal(next(keys), (c_out, c_out, 3, 3), jnp.float32)
        b2 = 0.1 * jax.random.normal(next(keys), (c_out,), jnp.float32)
        blocks.append((w1, b1, w2, b2))
    fw1 = 0.05 * jax.random.normal(next(keys), (hidden, flatten_dim), jnp.float32)
    fb1 = 0.05 * jax.random.normal(next(keys), (hidden,), jnp.float32)
    fw2 = 0.05 * jax.random.normal(next(keys), (n_out, hidden), jnp.float32)
    fb2 = 0.05 * jax.random.normal(next(keys), (n_out,), jnp.float32)
    return blocks, (fw1, fb1, fw2, fb2)


def reference_forward(x, torch_params):
    blocks, (fw1, fb1, fw2, fb2) = torch_params
    a = x
    for (w1, b1, w2, b2) in blocks:
        for wgt, bias in ((w1, b1), (w2, b2)):
            a = lax.conv_general_dilated(
                a, wgt, window_strides=(1, 1), padding="SAME",
                dimension_numbers=("NCHW", "OIHW", "NCHW"),
                precision=lax.Precision.HIGHEST)
            a = jnp.maximum(a + bias[None, :, None, None], 0.0)
        n, c, hh, ww = a.shape
        a = a.reshape(n, c, hh // 2, 2, ww // 2, 2).max(axis=(3, 5))
    a = a.reshape(a.shape[0], -1)
    h = jnp.maximum(jnp.dot(a, fw1.T, precision=lax.Precision.HIGHEST) + fb1, 0.0)
    return jnp.dot(h, fw2.T, precision=lax.Precision.HIGHEST) + fb2


# --------------------------------------------------------------------------- main

if __name__ == "__main__":
    # layers_dim = [4, 8, 16, 32, 10]: two conv blocks (4->8, 8->16), hidden=32, out=10, ReLU.
    layers_dim = [4, 8, 16, 32, 10]
    N, H, W = 2, 16, 16

    key = jax.random.PRNGKey(0)
    kx, kp = jax.random.split(key)
    x = jax.random.normal(kx, (N, layers_dim[0], H, W), jnp.float32)     # NCHW like PyTorch

    torch_params = init_torch_params(kp, layers_dim, (H, W))
    packed = pack_params(torch_params, layers_dim, (H, W), b_tile=B_TILE)

    roll_sgn = _probe_roll_sign()
    forward = build_simple_cnn_forward(layers_dim, (H, W), roll_sgn, b_tile=B_TILE)

    out = jax.block_until_ready(forward(x, packed))
    ref = jax.block_until_ready(reference_forward(x, torch_params))

    assert out.shape == (N, layers_dim[-1]), out.shape
    assert bool(jnp.all(jnp.isfinite(out)))
    max_err = float(jnp.max(jnp.abs(out - ref)))
    assert max_err < 5e-2, f"mismatch vs reference: {max_err}"
    print("KERNEL_OK")
</pallas_src>

<mosaic_0001>
module attributes {stable_mosaic.version = 11 : i64} {
  func.func @kernel(%arg0: memref<8x256xf32, #tpu.memory_space<vmem>>, %arg1: memref<8x256xf32, #tpu.memory_space<vmem>>) attributes {dimension_semantics = [], scalar_prefetch = 0 : i64, scratch_operands = 0 : i64, tpu.core_type = #tpu.core_type<tc>} {
    %c0 = arith.constant 0 : index
    %c0_0 = arith.constant 0 : index
    %0 = vector.load %arg0[%c0, %c0_0] : memref<8x256xf32, #tpu.memory_space<vmem>>, vector<8x256xf32>
    %c1_i32 = arith.constant 1 : i32
    %1 = tpu.dynamic_rotate %0 by %c1_i32 dim 1 : vector<8x256xf32>, i32 -> vector<8x256xf32>
    %c0_1 = arith.constant 0 : index
    %c0_2 = arith.constant 0 : index
    %2 = vector.load %arg1[%c0_1, %c0_2] : memref<8x256xf32, #tpu.memory_space<vmem>>, vector<8x256xf32>
    tpu.vector_store %arg1[%c0_1, %c0_2], %1 {strides = array<i32>} : memref<8x256xf32, #tpu.memory_space<vmem>>, vector<8x256xf32>,
    return
  }
}

</mosaic_0001>

<bundles_post_ra>
// kernel: tpu_custom_call.1
= control target key start
LH: loop header
LB: loop body
LE: loop exit
PB: predicated region body
PF: predicated region fallthrough
CT: control target
= control target key end

     0   :  { %6 = vsyncpa [#allocation3], 0  ;;  %s127_s0 = inlined_call_operand.hbm [shape: f32[8,256], index: 0, kind: input, shape index: {}]   ;;  %s128_s1 = inlined_call_operand.hbm [shape: f32[8,256], index: 1, kind: output, shape index: {}]  }
   0x1   :  { %7 = vsyncpa [#allocation4], 0  ;;  %s13_s8 = sshll.u32 %s127_s0, 4  ;;  %s108_s9 = smov [#allocation2]   ;;  %s14_s8 = int_to_ptr.hbm [resolvable:$true] %s13_s8 }
   0x2   :  { %s15_s10 = sshll.u32 %s108_s9, 4  ;;  %s16_s10 = int_to_ptr.vmem [resolvable:$true] %s15_s10 }
   0x3   :  { %18 = dma.hbm_to_vmem [thread:$0]  %s14_s8, 256, %s16_s10, [#allocation3]  }
   0x4   :  { %104 = dma.done.wait [#allocation3], 256  }
   0x5   :  { %105 = vsyncadd [#allocation3], 4294967040  ;;  %v23_v0 = vld [vmem:[#allocation2] sm:$0xff]  ;;  %s109_s11 = smov 1   ;;  %v24_v1 = vld [vmem:[#allocation2 + $0x8] sm:$0xff]  ;;  %v29_v2 = vlaneseq  ;;  %s110_s12 = smov [#allocation5]  }
   0x6   :  { %25 = vrot.lane.b32.xlu0 %v23_v0, %s109_s11  ;;  %s41_s13 = sshll.u32 %s110_s12, 4  ;;  %s43_s15 = sshll.u32 %s128_s1, 4  ;;  %s42_s13 = int_to_ptr.vmem [resolvable:$true] %s41_s13  ;;  %s44_s15 = int_to_ptr.hbm [resolvable:$true] %s43_s15 }
   0x7   :  { %v30_v4 = vand.u32 127, %v29_v2 }
   0x9   :  { %vm31_vm0 = vcmp.lt.s32.totalorder %v30_v4, 1 }
   0xe   :  { %27 = vrot.lane.b32.xlu0 %v24_v1, %s109_s11 }
  0x78   :  { %v26_v3 = vpop.permute.xlu0 %25 }
  0x80   :  { %v28_v5 = vpop.permute.xlu0 %27 }
  0x81   :  { %v32_v6 = vsel %vm31_vm0, %v26_v3, %v28_v5  ;;  %v33_v7 = vsel %vm31_vm0, %v28_v5, %v26_v3 }
  0x82   :  { %34 = vst [vmem:[#allocation5] sm:$0xff] %v33_v7 }
  0x83   :  { %35 = vst [vmem:[#allocation5 + $0x8] sm:$0xff] %v32_v6 }
  0x84   :  { %46 = dma.vmem_to_hbm [thread:$0]  %s42_s13, 256, %s44_s15, [#allocation4]  }
  0x85   :  { %106 = dma.done.wait [#allocation4], 256  }
  0x86   :  { %107 = vsyncadd [#allocation4], 4294967040 }
  0x87   :  { %51 = vsyncpa [#allocation3], 1 }
  0x88   :  { %52 = vsyncpa [#allocation4], 1 }

</bundles_post_ra>
